<compile_context>
chip_gen: v6e
topology: v6e:2x2x1
jax: 0.10.0
libtpu: 0.0.40
codegen_flags: <defaults>
</compile_context>

<pallas_src>
import functools
import math

import jax
import jax.numpy as jnp
from jax.experimental import pallas as pl
from jax.experimental.pallas import tpu as pltpu

_LANE = 128  # lane width — all feature dims padded to a multiple of this


def _round_up(n, m):
    return ((n + m - 1) // m) * m


def _cdiv(a, b):
    return -(-a // b)


def _chip_config():
    """Generation-aware knobs (VMEM budget, batch-tile cap, dtype preference, #TCs)."""
    kind = ""
    try:
        kind = jax.devices()[0].device_kind.lower()
    except Exception:
        pass
    if "v7" in kind:
        return {"vmem_bytes": 64 << 20, "max_tb": 512, "prefer_bf16": True, "two_tc": True}
    if "v6" in kind:
        return {"vmem_bytes": 128 << 20, "max_tb": 1024, "prefer_bf16": True, "two_tc": False}
    if "v5p" in kind or "v4" in kind:
        return {"vmem_bytes": 128 << 20, "max_tb": 1024, "prefer_bf16": False, "two_tc": True}
    if "v5" in kind:  # v5e / "v5 lite"
        return {"vmem_bytes": 128 << 20, "max_tb": 1024, "prefer_bf16": False, "two_tc": False}
    # Unknown chip: conservative (v7x-like VMEM budget, assume 2 TCs).
    return {"vmem_bytes": 64 << 20, "max_tb": 512, "prefer_bf16": False, "two_tc": True}


def _mlp_kernel(x_ref,
                w1_ref, b1_ref,
                w2_ref, b2_ref,
                w3_ref, b3_ref,
                w4_ref, b4_ref,
                o_ref):
    """Fused 4-layer MLP forward on one batch tile; weights stay VMEM-resident.

    Matmuls run on the MXU with f32 accumulation; bias adds / ReLU / tanh stay in f32
    on the VPU/EUP.  All feature dims are pre-padded to multiples of 128, so every
    load, matmul and store is lane-dense (unmasked vld/vst, full MXU N/K).
    """
    wdt = w1_ref.dtype
    x = x_ref[...]  # already cast to the weight dtype by the wrapper

    # hidden: Linear(in, 2h_pad) + ReLU
    h1 = jnp.dot(x, w1_ref[...], preferred_element_type=jnp.float32) + b1_ref[...]
    h1 = jnp.maximum(h1, 0.0)

    # hidden2: Linear(2h_pad, 2h_pad) + Tanh
    h2 = jnp.dot(h1.astype(wdt), w2_ref[...],
                 preferred_element_type=jnp.float32) + b2_ref[...]
    h2 = jnp.tanh(h2)

    # hidden3: Linear(2h_pad, h_pad) + ReLU
    h3 = jnp.dot(h2.astype(wdt), w3_ref[...],
                 preferred_element_type=jnp.float32) + b3_ref[...]
    h3 = jnp.maximum(h3, 0.0)

    # output: Linear(h_pad, out_pad) — lane-dense store
    o_ref[...] = (jnp.dot(h3.astype(wdt), w4_ref[...],
                          preferred_element_type=jnp.float32)
                  + b4_ref[...]).astype(o_ref.dtype)


def prepare_params(params, *, dtype=None):
    """One-time conversion of PyTorch-layout params to kernel layout.

    - weights transposed to (in_features, out_features)
    - every feature dim (2h, h, out) zero-padded to a multiple of 128 lanes
      (zero rows/cols + zero biases keep padded lanes exactly zero through
      ReLU/tanh, so the final slice recovers the exact unpadded result)
    - biases reshaped to (1, N), kept f32
    - weights cast to `dtype`; dtype=None picks bf16 on v6e/v7x, f32 elsewhere,
      and forces bf16 if resident f32 weights would crowd VMEM.
    """
    cfg = _chip_config()
    h2 = params["w1"].shape[0]        # 2 * hidden
    h = params["w3"].shape[0]         # hidden
    out_size = params["w4"].shape[0]
    in_size = params["w1"].shape[1]
    h2p = _round_up(h2, _LANE)
    hp = _round_up(h, _LANE)
    outp = _round_up(out_size, _LANE)

    if dtype is None:
        dtype = jnp.bfloat16 if cfg["prefer_bf16"] else jnp.float32
        f32_bytes = 4 * (in_size * h2p + h2p * h2p + h2p * hp + hp * outp)
        if f32_bytes > 0.7 * cfg["vmem_bytes"]:
            dtype = jnp.bfloat16  # resident f32 weights would not fit comfortably
        # TODO(synk): if even single-buffered bf16 weights exceed ~70% of VMEM
        # (hidden ~>2k), add a K-tiled "arbitrary" grid axis over the 2h contraction
        # instead of keeping all weights resident.

    def padw(w, rows_p, cols_p):
        # w is PyTorch layout (out_f, in_f); kernel wants (in_f_padded, out_f_padded).
        return jnp.pad(w.T, ((0, rows_p - w.shape[1]),
                             (0, cols_p - w.shape[0]))).astype(dtype)

    def padb(b, cols_p):
        return jnp.pad(b, (0, cols_p - b.shape[0]))[None, :].astype(jnp.float32)

    return {
        "w1": padw(params["w1"], in_size, h2p), "b1": padb(params["b1"], h2p),
        "w2": padw(params["w2"], h2p, h2p),     "b2": padb(params["b2"], h2p),
        "w3": padw(params["w3"], h2p, hp),      "b3": padb(params["b3"], hp),
        "w4": padw(params["w4"], hp, outp),     "b4": padb(params["b4"], outp),
    }


@functools.partial(jax.jit, static_argnames=("out_size", "single_buffer_weights"))
def net_forward(x, prep, *, out_size, single_buffer_weights=True):
    """x: (batch, input_size) f32; prep: output of prepare_params()."""
    cfg = _chip_config()
    batch, in_size = x.shape
    w1, w2, w3, w4 = prep["w1"], prep["w2"], prep["w3"], prep["w4"]
    b1, b2, b3, b4 = prep["b1"], prep["b2"], prep["b3"], prep["b4"]
    h2p = w1.shape[1]          # padded 2*hidden
    hp = w3.shape[1]           # padded hidden
    out_padded = w4.shape[1]   # padded out_size

    # Cast x to the weight dtype outside the kernel (bf16 path: halves x DMA bytes,
    # removes the per-tile VPU cast).
    if x.dtype != w1.dtype:
        x = x.astype(w1.dtype)

    # Balanced batch tiling (minimal row padding); >=2 grid steps on 2-TC chips so
    # dimension_semantics=("parallel",) actually shards the batch across both cores.
    ntiles = _cdiv(batch, cfg["max_tb"])
    if cfg["two_tc"] and ntiles == 1 and _round_up(batch, 8) >= 16:
        ntiles = 2
    tb = max(8, _round_up(_cdiv(batch, ntiles), 8))
    padded_batch = tb * _cdiv(batch, tb)
    if padded_batch != batch:
        x = jnp.pad(x, ((0, padded_batch - batch), (0, 0)))
    grid = (padded_batch // tb,)

    weights = (w1, b1, w2, b2, w3, b3, w4, b4)

    def resident(a):
        # Same block index for every grid point -> stays resident in VMEM.
        idx = lambda i: (0, 0)
        if single_buffer_weights:
            # Constant index_map: double-buffering is pure waste; single-buffer it.
            return pl.BlockSpec(a.shape, idx, pipeline_mode=pl.Buffered(1))
        return pl.BlockSpec(a.shape, idx)

    nbytes = lambda a: a.size * a.dtype.itemsize
    weight_bytes = sum(nbytes(a) for a in weights) * (1 if single_buffer_weights else 2)
    io_bytes = 2 * tb * (in_size * x.dtype.itemsize + out_padded * 4)  # dbl-buffered x/out
    vmem_limit = int(min(max(weight_bytes + io_bytes + (8 << 20), 32 << 20),
                         int(0.9 * cfg["vmem_bytes"])))

    flops = 2 * padded_batch * (in_size * h2p + h2p * h2p + h2p * hp + hp * out_padded)
    bytes_accessed = (nbytes(x) + sum(nbytes(a) for a in weights)
                      + padded_batch * out_padded * 4)
    cost = pl.CostEstimate(flops=flops,
                           transcendentals=padded_batch * h2p,  # tanh
                           bytes_accessed=bytes_accessed)

    out = pl.pallas_call(
        _mlp_kernel,
        out_shape=jax.ShapeDtypeStruct((padded_batch, out_padded), jnp.float32),
        grid=grid,
        in_specs=[pl.BlockSpec((tb, in_size), lambda i: (i, 0))]
                 + [resident(a) for a in weights],
        out_specs=pl.BlockSpec((tb, out_padded), lambda i: (i, 0)),
        compiler_params=pltpu.CompilerParams(
            dimension_semantics=("parallel",),   # shard batch grid across TCs
            vmem_limit_bytes=vmem_limit),
        cost_estimate=cost,
    )(x, *weights)

    if padded_batch == batch and out_padded == out_size:
        return out
    return out[:batch, :out_size]


def init_params(key, input_size, hidden_size, output_size):
    """Deterministic init mimicking PyTorch nn.Linear default
    (uniform(-1/sqrt(fan_in), 1/sqrt(fan_in)) for both weight and bias).
    Stored in PyTorch layout (out_features, in_features)."""
    dims = [
        (hidden_size * 2, input_size),       # hidden
        (hidden_size * 2, hidden_size * 2),  # hidden2
        (hidden_size, hidden_size * 2),      # hidden3
        (output_size, hidden_size),          # output
    ]
    params = {}
    keys = jax.random.split(key, 2 * len(dims))
    for i, (out_f, in_f) in enumerate(dims):
        bound = 1.0 / math.sqrt(in_f)
        params[f"w{i+1}"] = jax.random.uniform(
            keys[2 * i], (out_f, in_f), jnp.float32, -bound, bound)
        params[f"b{i+1}"] = jax.random.uniform(
            keys[2 * i + 1], (out_f,), jnp.float32, -bound, bound)
    return params


def _reference(x, params):
    """Pure-JAX reference (mirrors the PyTorch forward)."""
    h1 = jnp.maximum(x @ params["w1"].T + params["b1"], 0.0)
    h2 = jnp.tanh(h1 @ params["w2"].T + params["b2"])
    h3 = jnp.maximum(h2 @ params["w3"].T + params["b3"], 0.0)
    return h3 @ params["w4"].T + params["b4"]


if __name__ == "__main__":
    # Small shapes consistent with the module's forward.
    batch, input_size, hidden_size, output_size = 8, 32, 32, 8

    key = jax.random.PRNGKey(0)
    k_x, k_p = jax.random.split(key)
    x = jax.random.normal(k_x, (batch, input_size), jnp.float32)
    params = init_params(k_p, input_size, hidden_size, output_size)
    ref = _reference(x, params)

    state = {"single_buffer": True}

    def run(xv, prep):
        if state["single_buffer"]:
            try:
                return jax.block_until_ready(net_forward(
                    xv, prep, out_size=output_size, single_buffer_weights=True))
            except Exception:
                # Installed jax may lack BlockSpec(pipeline_mode=pl.Buffered(1));
                # fall back to default double-buffered resident weights.
                state["single_buffer"] = False
        return jax.block_until_ready(net_forward(
            xv, prep, out_size=output_size, single_buffer_weights=False))

    # f32 weights: exact match to the PyTorch-convention reference.
    prep_f32 = prepare_params(params, dtype=jnp.float32)
    out = run(x, prep_f32)
    assert out.shape == (batch, output_size)
    assert jnp.allclose(out, ref, atol=1e-5, rtol=1e-5), "f32 mismatch vs reference"

    # Generation-default weights (bf16 on v6e/v7x, f32 on v5e/other), f32 accumulation.
    prep_auto = prepare_params(params)
    out_auto = run(x, prep_auto)
    assert out_auto.shape == (batch, output_size)
    assert jnp.allclose(out_auto, ref, atol=5e-2, rtol=5e-2), "auto-dtype mismatch vs reference"

    print("KERNEL_OK")
</pallas_src>

<mosaic_0001>
module attributes {stable_mosaic.version = 11 : i64} {
  func.func @_mlp_kernel(%arg0: i32, %arg1: memref<8x32xf32, #tpu.memory_space<vmem>>, %arg2: memref<32x128xf32, #tpu.memory_space<vmem>>, %arg3: memref<1x128xf32, #tpu.memory_space<vmem>>, %arg4: memref<128x128xf32, #tpu.memory_space<vmem>>, %arg5: memref<1x128xf32, #tpu.memory_space<vmem>>, %arg6: memref<128x128xf32, #tpu.memory_space<vmem>>, %arg7: memref<1x128xf32, #tpu.memory_space<vmem>>, %arg8: memref<128x128xf32, #tpu.memory_space<vmem>>, %arg9: memref<1x128xf32, #tpu.memory_space<vmem>>, %arg10: memref<8x128xf32, #tpu.memory_space<vmem>>) attributes {dimension_semantics = [#tpu.dimension_semantics<parallel>], iteration_bounds = array<i64: 1>, scalar_prefetch = 0 : i64, scratch_operands = 0 : i64, tpu.core_type = #tpu.core_type<tc>, window_params = [{transform_indices = @transform_0, window_bounds = array<i64: 8, 32>}, {pipeline_mode = #tpu.pipeline_mode<synchronous>, transform_indices = @transform_1, window_bounds = array<i64: 32, 128>}, {pipeline_mode = #tpu.pipeline_mode<synchronous>, transform_indices = @transform_2, window_bounds = array<i64: 1, 128>}, {pipeline_mode = #tpu.pipeline_mode<synchronous>, transform_indices = @transform_3, window_bounds = array<i64: 128, 128>}, {pipeline_mode = #tpu.pipeline_mode<synchronous>, transform_indices = @transform_4, window_bounds = array<i64: 1, 128>}, {pipeline_mode = #tpu.pipeline_mode<synchronous>, transform_indices = @transform_5, window_bounds = array<i64: 128, 128>}, {pipeline_mode = #tpu.pipeline_mode<synchronous>, transform_indices = @transform_6, window_bounds = array<i64: 1, 128>}, {pipeline_mode = #tpu.pipeline_mode<synchronous>, transform_indices = @transform_7, window_bounds = array<i64: 128, 128>}, {pipeline_mode = #tpu.pipeline_mode<synchronous>, transform_indices = @transform_8, window_bounds = array<i64: 1, 128>}, {transform_indices = @transform_9, window_bounds = array<i64: 8, 128>}]} {
    %c0 = arith.constant 0 : index
    %c0_0 = arith.constant 0 : index
    %0 = vector.load %arg1[%c0, %c0_0] : memref<8x32xf32, #tpu.memory_space<vmem>>, vector<8x32xf32>
    %c0_1 = arith.constant 0 : index
    %c0_2 = arith.constant 0 : index
    %1 = vector.load %arg2[%c0_1, %c0_2] : memref<32x128xf32, #tpu.memory_space<vmem>>, vector<32x128xf32>
    %cst = arith.constant dense<0.000000e+00> : vector<8x128xf32>
    %2 = tpu.matmul %0, %1, %cst {dimension_numbers = #tpu.dot_dimension_numbers<[1], [0], [0], [1], [0, 0, 1, 1], [], []>} : vector<8x32xf32>, vector<32x128xf32>, vector<8x128xf32> -> vector<8x128xf32>
    %c0_3 = arith.constant 0 : index
    %c0_4 = arith.constant 0 : index
    %3 = vector.load %arg3[%c0_3, %c0_4] : memref<1x128xf32, #tpu.memory_space<vmem>>, vector<1x128xf32>
    %4 = vector.broadcast %3 : vector<1x128xf32> to vector<8x128xf32>
    %5 = arith.addf %2, %4 : vector<8x128xf32>
    %cst_5 = arith.constant 0.000000e+00 : f32
    %6 = vector.broadcast %cst_5 : f32 to vector<8x128xf32>
    %7 = arith.maximumf %5, %6 : vector<8x128xf32>
    %c0_6 = arith.constant 0 : index
    %c0_7 = arith.constant 0 : index
    %8 = vector.load %arg4[%c0_6, %c0_7] : memref<128x128xf32, #tpu.memory_space<vmem>>, vector<128x128xf32>
    %cst_8 = arith.constant dense<0.000000e+00> : vector<8x128xf32>
    %9 = tpu.matmul %7, %8, %cst_8 {dimension_numbers = #tpu.dot_dimension_numbers<[1], [0], [0], [1], [0, 0, 1, 1], [], []>} : vector<8x128xf32>, vector<128x128xf32>, vector<8x128xf32> -> vector<8x128xf32>
    %c0_9 = arith.constant 0 : index
    %c0_10 = arith.constant 0 : index
    %10 = vector.load %arg5[%c0_9, %c0_10] : memref<1x128xf32, #tpu.memory_space<vmem>>, vector<1x128xf32>
    %11 = vector.broadcast %10 : vector<1x128xf32> to vector<8x128xf32>
    %12 = arith.addf %9, %11 : vector<8x128xf32>
    %13 = math.tanh %12 : vector<8x128xf32>
    %c0_11 = arith.constant 0 : index
    %c0_12 = arith.constant 0 : index
    %14 = vector.load %arg6[%c0_11, %c0_12] : memref<128x128xf32, #tpu.memory_space<vmem>>, vector<128x128xf32>
    %cst_13 = arith.constant dense<0.000000e+00> : vector<8x128xf32>
    %15 = tpu.matmul %13, %14, %cst_13 {dimension_numbers = #tpu.dot_dimension_numbers<[1], [0], [0], [1], [0, 0, 1, 1], [], []>} : vector<8x128xf32>, vector<128x128xf32>, vector<8x128xf32> -> vector<8x128xf32>
    %c0_14 = arith.constant 0 : index
    %c0_15 = arith.constant 0 : index
    %16 = vector.load %arg7[%c0_14, %c0_15] : memref<1x128xf32, #tpu.memory_space<vmem>>, vector<1x128xf32>
    %17 = vector.broadcast %16 : vector<1x128xf32> to vector<8x128xf32>
    %18 = arith.addf %15, %17 : vector<8x128xf32>
    %cst_16 = arith.constant 0.000000e+00 : f32
    %19 = vector.broadcast %cst_16 : f32 to vector<8x128xf32>
    %20 = arith.maximumf %18, %19 : vector<8x128xf32>
    %c0_17 = arith.constant 0 : index
    %c0_18 = arith.constant 0 : index
    %21 = vector.load %arg8[%c0_17, %c0_18] : memref<128x128xf32, #tpu.memory_space<vmem>>, vector<128x128xf32>
    %cst_19 = arith.constant dense<0.000000e+00> : vector<8x128xf32>
    %22 = tpu.matmul %20, %21, %cst_19 {dimension_numbers = #tpu.dot_dimension_numbers<[1], [0], [0], [1], [0, 0, 1, 1], [], []>} : vector<8x128xf32>, vector<128x128xf32>, vector<8x128xf32> -> vector<8x128xf32>
    %c0_20 = arith.constant 0 : index
    %c0_21 = arith.constant 0 : index
    %23 = vector.load %arg9[%c0_20, %c0_21] : memref<1x128xf32, #tpu.memory_space<vmem>>, vector<1x128xf32>
    %24 = vector.broadcast %23 : vector<1x128xf32> to vector<8x128xf32>
    %25 = arith.addf %22, %24 : vector<8x128xf32>
    %c0_22 = arith.constant 0 : index
    %c0_23 = arith.constant 0 : index
    %26 = vector.load %arg10[%c0_22, %c0_23] : memref<8x128xf32, #tpu.memory_space<vmem>>, vector<8x128xf32>
    tpu.vector_store %arg10[%c0_22, %c0_23], %25 {strides = array<i32>} : memref<8x128xf32, #tpu.memory_space<vmem>>, vector<8x128xf32>,
    return
  }
  func.func @transform_0(%arg0: i32) -> (i32, i32) {
    %c0_i32 = arith.constant 0 : i32
    %c0_i32_0 = arith.constant 0 : i32
    return %arg0, %c0_i32 : i32, i32
  }
  func.func @transform_1(%arg0: i32) -> (i32, i32) {
    %c0_i32 = arith.constant 0 : i32
    %c0_i32_0 = arith.constant 0 : i32
    %c0_i32_1 = arith.constant 0 : i32
    return %c0_i32, %c0_i32_0 : i32, i32
  }
  func.func @transform_2(%arg0: i32) -> (i32, i32) {
    %c0_i32 = arith.constant 0 : i32
    %c0_i32_0 = arith.constant 0 : i32
    %c0_i32_1 = arith.constant 0 : i32
    return %c0_i32, %c0_i32_0 : i32, i32
  }
  func.func @transform_3(%arg0: i32) -> (i32, i32) {
    %c0_i32 = arith.constant 0 : i32
    %c0_i32_0 = arith.constant 0 : i32
    %c0_i32_1 = arith.constant 0 : i32
    return %c0_i32, %c0_i32_0 : i32, i32
  }
  func.func @transform_4(%arg0: i32) -> (i32, i32) {
    %c0_i32 = arith.constant 0 : i32
    %c0_i32_0 = arith.constant 0 : i32
    %c0_i32_1 = arith.constant 0 : i32
    return %c0_i32, %c0_i32_0 : i32, i32
  }
  func.func @transform_5(%arg0: i32) -> (i32, i32) {
    %c0_i32 = arith.constant 0 : i32
    %c0_i32_0 = arith.constant 0 : i32
    %c0_i32_1 = arith.constant 0 : i32
    return %c0_i32, %c0_i32_0 : i32, i32
  }
  func.func @transform_6(%arg0: i32) -> (i32, i32) {
    %c0_i32 = arith.constant 0 : i32
    %c0_i32_0 = arith.constant 0 : i32
    %c0_i32_1 = arith.constant 0 : i32
    return %c0_i32, %c0_i32_0 : i32, i32
  }
  func.func @transform_7(%arg0: i32) -> (i32, i32) {
    %c0_i32 = arith.constant 0 : i32
    %c0_i32_0 = arith.constant 0 : i32
    %c0_i32_1 = arith.constant 0 : i32
    return %c0_i32, %c0_i32_0 : i32, i32
  }
  func.func @transform_8(%arg0: i32) -> (i32, i32) {
    %c0_i32 = arith.constant 0 : i32
    %c0_i32_0 = arith.constant 0 : i32
    %c0_i32_1 = arith.constant 0 : i32
    return %c0_i32, %c0_i32_0 : i32, i32
  }
  func.func @transform_9(%arg0: i32) -> (i32, i32) {
    %c0_i32 = arith.constant 0 : i32
    %c0_i32_0 = arith.constant 0 : i32
    return %arg0, %c0_i32 : i32, i32
  }
}

module attributes {stable_mosaic.version = 11 : i64} {
  func.func @_mlp_kernel(%arg0: i32, %arg1: memref<8x32xf32, #tpu.memory_space<vmem>>, %arg2: memref<32x128xf32, #tpu.memory_space<vmem>>, %arg3: memref<1x128xf32, #tpu.memory_space<vmem>>, %arg4: memref<128x128xf32, #tpu.memory_space<vmem>>, %arg5: memref<1x128xf32, #tpu.memory_space<vmem>>, %arg6: memref<128x128xf32, #tpu.memory_space<vmem>>, %arg7: memref<1x128xf32, #tpu.memory_space<vmem>>, %arg8: memref<128x128xf32, #tpu.memory_space<vmem>>, %arg9: memref<1x128xf32, #tpu.memory_space<vmem>>, %arg10: memref<8x128xf32, #tpu.memory_space<vmem>>) attributes {dimension_semantics = [#tpu.dimension_semantics<parallel>], iteration_bounds = array<i64: 1>, scalar_prefetch = 0 : i64, scratch_operands = 0 : i64, tpu.core_type = #tpu.core_type<tc>, window_params = [{transform_indices = @transform_0, window_bounds = array<i64: 8, 32>}, {pipeline_mode = #tpu.pipeline_mode<synchronous>, transform_indices = @transform_1, window_bounds = array<i64: 32, 128>}, {pipeline_mode = #tpu.pipeline_mode<synchronous>, transform_indices = @transform_2, window_bounds = array<i64: 1, 128>}, {pipeline_mode = #tpu.pipeline_mode<synchronous>, transform_indices = @transform_3, window_bounds = array<i64: 128, 128>}, {pipeline_mode = #tpu.pipeline_mode<synchronous>, transform_indices = @transform_4, window_bounds = array<i64: 1, 128>}, {pipeline_mode = #tpu.pipeline_mode<synchronous>, transform_indices = @transform_5, window_bounds = array<i64: 128, 128>}, {pipeline_mode = #tpu.pipeline_mode<synchronous>, transform_indices = @transform_6, window_bounds = array<i64: 1, 128>}, {pipeline_mode = #tpu.pipeline_mode<synchronous>, transform_indices = @transform_7, window_bounds = array<i64: 128, 128>}, {pipeline_mode = #tpu.pipeline_mode<synchronous>, transform_indices = @transform_8, window_bounds = array<i64: 1, 128>}, {transform_indices = @transform_9, window_bounds = array<i64: 8, 128>}]} {
    %c0 = arith.constant 0 : index
    %c0_0 = arith.constant 0 : index
    %0 = vector.load %arg1[%c0, %c0_0] : memref<8x32xf32, #tpu.memory_space<vmem>>, vector<8x32xf32>
    %c0_1 = arith.constant 0 : index
    %c0_2 = arith.constant 0 : index
    %1 = vector.load %arg2[%c0_1, %c0_2] : memref<32x128xf32, #tpu.memory_space<vmem>>, vector<32x128xf32>
    %cst = arith.constant dense<0.000000e+00> : vector<8x128xf32>
    %2 = tpu.matmul %0, %1, %cst {dimension_numbers = #tpu.dot_dimension_numbers<[1], [0], [0], [1], [0, 0, 1, 1], [], []>} : vector<8x32xf32>, vector<32x128xf32>, vector<8x128xf32> -> vector<8x128xf32>
    %c0_3 = arith.constant 0 : index
    %c0_4 = arith.constant 0 : index
    %3 = vector.load %arg3[%c0_3, %c0_4] : memref<1x128xf32, #tpu.memory_space<vmem>>, vector<1x128xf32>
    %4 = vector.broadcast %3 : vector<1x128xf32> to vector<8x128xf32>
    %5 = arith.addf %2, %4 : vector<8x128xf32>
    %cst_5 = arith.constant 0.000000e+00 : f32
    %6 = vector.broadcast %cst_5 : f32 to vector<8x128xf32>
    %7 = arith.maximumf %5, %6 : vector<8x128xf32>
    %c0_6 = arith.constant 0 : index
    %c0_7 = arith.constant 0 : index
    %8 = vector.load %arg4[%c0_6, %c0_7] : memref<128x128xf32, #tpu.memory_space<vmem>>, vector<128x128xf32>
    %cst_8 = arith.constant dense<0.000000e+00> : vector<8x128xf32>
    %9 = tpu.matmul %7, %8, %cst_8 {dimension_numbers = #tpu.dot_dimension_numbers<[1], [0], [0], [1], [0, 0, 1, 1], [], []>} : vector<8x128xf32>, vector<128x128xf32>, vector<8x128xf32> -> vector<8x128xf32>
    %c0_9 = arith.constant 0 : index
    %c0_10 = arith.constant 0 : index
    %10 = vector.load %arg5[%c0_9, %c0_10] : memref<1x128xf32, #tpu.memory_space<vmem>>, vector<1x128xf32>
    %11 = vector.broadcast %10 : vector<1x128xf32> to vector<8x128xf32>
    %12 = arith.addf %9, %11 : vector<8x128xf32>
    %13 = math.tanh %12 : vector<8x128xf32>
    %c0_11 = arith.constant 0 : index
    %c0_12 = arith.constant 0 : index
    %14 = vector.load %arg6[%c0_11, %c0_12] : memref<128x128xf32, #tpu.memory_space<vmem>>, vector<128x128xf32>
    %cst_13 = arith.constant dense<0.000000e+00> : vector<8x128xf32>
    %15 = tpu.matmul %13, %14, %cst_13 {dimension_numbers = #tpu.dot_dimension_numbers<[1], [0], [0], [1], [0, 0, 1, 1], [], []>} : vector<8x128xf32>, vector<128x128xf32>, vector<8x128xf32> -> vector<8x128xf32>
    %c0_14 = arith.constant 0 : index
    %c0_15 = arith.constant 0 : index
    %16 = vector.load %arg7[%c0_14, %c0_15] : memref<1x128xf32, #tpu.memory_space<vmem>>, vector<1x128xf32>
    %17 = vector.broadcast %16 : vector<1x128xf32> to vector<8x128xf32>
    %18 = arith.addf %15, %17 : vector<8x128xf32>
    %cst_16 = arith.constant 0.000000e+00 : f32
    %19 = vector.broadcast %cst_16 : f32 to vector<8x128xf32>
    %20 = arith.maximumf %18, %19 : vector<8x128xf32>
    %c0_17 = arith.constant 0 : index
    %c0_18 = arith.constant 0 : index
    %21 = vector.load %arg8[%c0_17, %c0_18] : memref<128x128xf32, #tpu.memory_space<vmem>>, vector<128x128xf32>
    %cst_19 = arith.constant dense<0.000000e+00> : vector<8x128xf32>
    %22 = tpu.matmul %20, %21, %cst_19 {dimension_numbers = #tpu.dot_dimension_numbers<[1], [0], [0], [1], [0, 0, 1, 1], [], []>} : vector<8x128xf32>, vector<128x128xf32>, vector<8x128xf32> -> vector<8x128xf32>
    %c0_20 = arith.constant 0 : index
    %c0_21 = arith.constant 0 : index
    %23 = vector.load %arg9[%c0_20, %c0_21] : memref<1x128xf32, #tpu.memory_space<vmem>>, vector<1x128xf32>
    %24 = vector.broadcast %23 : vector<1x128xf32> to vector<8x128xf32>
    %25 = arith.addf %22, %24 : vector<8x128xf32>
    %c0_22 = arith.constant 0 : index
    %c0_23 = arith.constant 0 : index
    %26 = vector.load %arg10[%c0_22, %c0_23] : memref<8x128xf32, #tpu.memory_space<vmem>>, vector<8x128xf32>
    tpu.vector_store %arg10[%c0_22, %c0_23], %25 {strides = array<i32>} : memref<8x128xf32, #tpu.memory_space<vmem>>, vector<8x128xf32>,
    return
  }
  func.func @transform_0(%arg0: i32) -> (i32, i32) {
    %c0_i32 = arith.constant 0 : i32
    %c0_i32_0 = arith.constant 0 : i32
    return %arg0, %c0_i32 : i32, i32
  }
  func.func @transform_1(%arg0: i32) -> (i32, i32) {
    %c0_i32 = arith.constant 0 : i32
    %c0_i32_0 = arith.constant 0 : i32
    %c0_i32_1 = arith.constant 0 : i32
    return %c0_i32, %c0_i32_0 : i32, i32
  }
  func.func @transform_2(%arg0: i32) -> (i32, i32) {
    %c0_i32 = arith.constant 0 : i32
    %c0_i32_0 = arith.constant 0 : i32
    %c0_i32_1 = arith.constant 0 : i32
    return %c0_i32, %c0_i32_0 : i32, i32
  }
  func.func @transform_3(%arg0: i32) -> (i32, i32) {
    %c0_i32 = arith.constant 0 : i32
    %c0_i32_0 = arith.constant 0 : i32
    %c0_i32_1 = arith.constant 0 : i32
    return %c0_i32, %c0_i32_0 : i32, i32
  }
  func.func @transform_4(%arg0: i32) -> (i32, i32) {
    %c0_i32 = arith.constant 0 : i32
    %c0_i32_0 = arith.constant 0 : i32
    %c0_i32_1 = arith.constant 0 : i32
    return %c0_i32, %c0_i32_0 : i32, i32
  }
  func.func @transform_5(%arg0: i32) -> (i32, i32) {
    %c0_i32 = arith.constant 0 : i32
    %c0_i32_0 = arith.constant 0 : i32
    %c0_i32_1 = arith.constant 0 : i32
    return %c0_i32, %c0_i32_0 : i32, i32
  }
  func.func @transform_6(%arg0: i32) -> (i32, i32) {
    %c0_i32 = arith.constant 0 : i32
    %c0_i32_0 = arith.constant 0 : i32
    %c0_i32_1 = arith.constant 0 : i32
    return %c0_i32, %c0_i32_0 : i32, i32
  }
  func.func @transform_7(%arg0: i32) -> (i32, i32) {
    %c0_i32 = arith.constant 0 : i32
    %c0_i32_0 = arith.constant 0 : i32
    %c0_i32_1 = arith.constant 0 : i32
    return %c0_i32, %c0_i32_0 : i32, i32
  }
  func.func @transform_8(%arg0: i32) -> (i32, i32) {
    %c0_i32 = arith.constant 0 : i32
    %c0_i32_0 = arith.constant 0 : i32
    %c0_i32_1 = arith.constant 0 : i32
    return %c0_i32, %c0_i32_0 : i32, i32
  }
  func.func @transform_9(%arg0: i32) -> (i32, i32) {
    %c0_i32 = arith.constant 0 : i32
    %c0_i32_0 = arith.constant 0 : i32
    return %arg0, %c0_i32 : i32, i32
  }
}

</mosaic_0001>

<bundles_post_ra>
// kernel: net_forward.1
= control target key start
LH: loop header
LB: loop body
LE: loop exit
PB: predicated region body
PF: predicated region fallthrough
CT: control target
= control target key end

     0   :  { %14 = vsyncpa [#allocation3], 0  ;;  %s964_s0 = inlined_call_operand.hbm [shape: f32[8,32], index: 0, kind: input, shape index: {}]   ;;  %s965_s1 = inlined_call_operand.hbm [shape: f32[32,128], index: 1, kind: input, shape index: {}]   ;;  %s966_s2 = inlined_call_operand.vmem [shape: f32[1,128], index: 2, kind: input, shape index: {}]   ;;  %s967_s3 = inlined_call_operand.hbm [shape: f32[128,128], index: 3, kind: input, shape index: {}]   ;;  %s968_s4 = inlined_call_operand.vmem [shape: f32[1,128], index: 4, kind: input, shape index: {}]   ;;  %s969_s5 = inlined_call_operand.hbm [shape: f32[128,128], index: 5, kind: input, shape index: {}]   ;;  %s970_s6 = inlined_call_operand.vmem [shape: f32[1,128], index: 6, kind: input, shape index: {}]   ;;  %s971_s7 = inlined_call_operand.hbm [shape: f32[128,128], index: 7, kind: input, shape index: {}]   ;;  %s972_s8 = inlined_call_operand.vmem [shape: f32[1,128], index: 8, kind: input, shape index: {}]   ;;  %s973_s9 = inlined_call_operand.hbm [shape: f32[8,128], index: 9, kind: output, shape index: {}]  }
   0x1   :  { %15 = vsyncpa [#allocation6], 0 }
   0x2   :  { %16 = vsyncpa [#allocation9], 0 }
   0x3   :  { %17 = vsyncpa [#allocation4], 0  ;;  %s802_s30 = smov [#allocation5]  }
   0x4   :  { %s33_s10 = sshll.u32 %s802_s30, 4  ;;  %s34_s10 = int_to_ptr.vmem [resolvable:$true] %s33_s10 }
   0x5   :  { %s682_s11 = scalar_lea.vmem %s34_s10, 512  ;;  %p687_p1 = scmp.lt.s32.totalorder %s34_s10, %s34_s10 }
   0x6   :  { %p683_p0 = scmp.ne.s32.totalorder %s34_s10, %s682_s11  ;;  %p688_p2 = scmp.lt.s32.totalorder %s682_s11, %s682_s11 }
   0x8   :  { %p689_p3 = por %p688_p2, %p687_p1 }
   0xa   :  { %p690_p4 = pnand %p689_p3, %p683_p0 }
   0xc   :  { %693 = shalt.err (!%p690_p4)
}
   0xd   :  { %s803_s12 = smov 128   ;;  %s804_s13 = smov 8  }
   0xe   :  { %39 = dma.hbm_to_vmem [thread:$0]  %s965_s1, 512, %s34_s10, [#allocation6], %s803_s12, %s803_s12, %s804_s13  }
   0xf   :  { %s805_s16 = smov [#allocation8]   ;;  %s806_s18 = smov [#allocation2]  }
  0x10   :  { %s61_s17 = sshll.u32 %s805_s16, 4  ;;  %s24_s19 = sshll.u32 %s806_s18, 4  ;;  %s62_s17 = int_to_ptr.vmem [resolvable:$true] %s61_s17  ;;  %s25_s19 = int_to_ptr.vmem [resolvable:$true] %s24_s19 }
  0x11   :  { %s702_s20 = scalar_lea.vmem %s62_s17, 2048  ;;  %p707_p6 = scmp.lt.s32.totalorder %s62_s17, %s62_s17 }
  0x12   :  { %p703_p5 = scmp.ne.s32.totalorder %s62_s17, %s702_s20  ;;  %p708_p7 = scmp.lt.s32.totalorder %s702_s20, %s702_s20 }
  0x14   :  { %p709_p8 = por %p708_p7, %p707_p6 }
  0x16   :  { %p710_p9 = pnand %p709_p8, %p703_p5 }
  0x18   :  { %713 = shalt.err (!%p710_p9)
}
  0x19   :  { %67 = dma.hbm_to_vmem [thread:$0]  %s969_s5, 2048, %s62_s17, [#allocation9], %s803_s12, %s803_s12, %s804_s13  }
  0x1a   :  { %s722_s1 = scalar_lea.vmem %s25_s19, 128  ;;  %p727_p11 = scmp.lt.s32.totalorder %s25_s19, %s25_s19 }
  0x1b   :  { %p723_p10 = scmp.ne.s32.totalorder %s25_s19, %s722_s1  ;;  %p728_p12 = scmp.lt.s32.totalorder %s722_s1, %s722_s1 }
  0x1d   :  { %p729_p13 = por %p728_p12, %p727_p11 }
  0x1f   :  { %p730_p0 = pnand %p729_p13, %p723_p10 }
  0x21   :  { %733 = shalt.err (!%p730_p0)
}
  0x22   :  { %27 = dma.hbm_to_vmem [thread:$0]  %s964_s0, 128, %s25_s19, [#allocation3]  }
  0x23   :  { %s807_s25 = smov [#allocation7]   ;;  %s808_s27 = smov [#allocation10]  }
  0x24   :  { %s47_s26 = sshll.u32 %s807_s25, 4  ;;  %s75_s28 = sshll.u32 %s808_s27, 4  ;;  %s48_s26 = int_to_ptr.vmem [resolvable:$true] %s47_s26  ;;  %s76_s28 = int_to_ptr.vmem [resolvable:$true] %s75_s28 }
  0x25   :  { %s742_s29 = scalar_lea.vmem %s48_s26, 2048  ;;  %p747_p2 = scmp.lt.s32.totalorder %s48_s26, %s48_s26 }
  0x26   :  { %p743_p1 = scmp.ne.s32.totalorder %s48_s26, %s742_s29  ;;  %p748_p3 = scmp.lt.s32.totalorder %s742_s29, %s742_s29 }
  0x28   :  { %p749_p4 = por %p748_p3, %p747_p2 }
  0x2a   :  { %p750_p5 = pnand %p749_p4, %p743_p1 }
  0x2c   :  { %753 = shalt.err (!%p750_p5)
}
  0x2d   :  { %53 = dma.hbm_to_vmem [thread:$0]  %s967_s3, 2048, %s48_s26, [#allocation6], %s803_s12, %s803_s12, %s804_s13  }
  0x2e   :  { %s762_s0 = scalar_lea.vmem %s76_s28, 2048  ;;  %p767_p7 = scmp.lt.s32.totalorder %s76_s28, %s76_s28 }
  0x2f   :  { %p763_p6 = scmp.ne.s32.totalorder %s76_s28, %s762_s0  ;;  %p768_p8 = scmp.lt.s32.totalorder %s762_s0, %s762_s0 }
  0x31   :  { %p769_p9 = por %p768_p8, %p767_p7 }
  0x33   :  { %p770_p10 = pnand %p769_p9, %p763_p6 }
  0x35   :  { %773 = shalt.err (!%p770_p10)
}
  0x36   :  { %81 = dma.hbm_to_vmem [thread:$0]  %s971_s7, 2048, %s76_s28, [#allocation9], %s803_s12, %s803_s12, %s804_s13  }
  0x37   :  { %794 = dma.done.wait [#allocation3], 128  }
  0x38   :  { %795 = vsyncadd [#allocation3], 4294967168 }
  0x39   :  { %796 = dma.done.wait [#allocation6], 2560  }
  0x3a   :  { %797 = vsyncadd [#allocation6], 4294964736 }
  0x3b   :  { %798 = dma.done.wait [#allocation9], 4096  }
  0x3c   :  { %799 = vsyncadd [#allocation9], 4294963200  ;;  %v809_v0 = vmov 0.0   ;;  %vm810_vm0 = vmmov 0   ;;  %v103_v1 = vld [vmem:[#allocation5 + $0x18] sm:$0xff]  ;;  %v102_v2 = vld [vmem:[#allocation5 + $0x10] sm:$0xff] }
  0x3d   :  { %546 = vmatprep.subr.mxu0 %v809_v0  ;;  %554 = vmatprep.mubr.msk.f32.mxu0 %vm810_vm0, %v809_v0  ;;  %v201_v3 = vld [vmem:[#allocation7 + $0x78] sm:$0xff]  ;;  %v101_v4 = vld [vmem:[#allocation5 + $0x8] sm:$0xff]  ;;  %v200_v5 = vld [vmem:[#allocation7 + $0x70] sm:$0xff]  ;;  %vm111_vm1 = vcmask 261120   ;;  %s811_s16 = smov [#allocation11]  }
  0x3e   :  { %557 = vmatprep.subr.mxu1 %v809_v0  ;;  %589 = vmatprep.mubr.msk.f32.mxu1 %vm810_vm0, %v809_v0  ;;  %v199_v6 = vld [vmem:[#allocation7 + $0x68] sm:$0xff]  ;;  %v100_v7 = vld [vmem:[#allocation5] sm:$0xff]  ;;  %v99_v8 = vld [vmem:[#allocation2] sm:$0xff]  ;;  %s474_s17 = sshll.u32 %s811_s16, 4  ;;  %s475_s17 = int_to_ptr.vmem [resolvable:$true] %s474_s17 }
  0x3f   :  { %547 = vmatpush3.msra.mxu0 %v103_v1  ;;  %558 = vmatpush3.msra.mxu1 %v201_v3  ;;  %v198_v9 = vld [vmem:[#allocation7 + $0x60] sm:$0xff]  ;;  %v197_v10 = vld [vmem:[#allocation7 + $0x58] sm:$0xff]  ;;  %v196_v11 = vld [vmem:[#allocation7 + $0x50] sm:$0xff]  ;;  %s774_s18 = scalar_lea.vmem %s475_s17, 128  ;;  %p779_p12 = scmp.lt.s32.totalorder %s475_s17, %s475_s17 }
  0x40   :  { %548 = vmatprep.subr.mxu0 %v809_v0  ;;  %559 = vmatprep.subr.mxu1 %v809_v0  ;;  %v195_v12 = vld [vmem:[#allocation7 + $0x48] sm:$0xff]  ;;  %v194_v13 = vld [vmem:[#allocation7 + $0x40] sm:$0xff]  ;;  %v193_v14 = vld [vmem:[#allocation7 + $0x38] sm:$0xff]  ;;  %p775_p11 = scmp.ne.s32.totalorder %s475_s17, %s774_s18  ;;  %p780_p13 = scmp.lt.s32.totalorder %s774_s18, %s774_s18 }
  0x41   :  { %549 = vmatpush3.msra.mxu0 %v102_v2  ;;  %560 = vmatpush3.msra.mxu1 %v200_v5  ;;  %v192_v15 = vld [vmem:[#allocation7 + $0x30] sm:$0xff]  ;;  %v191_v16 = vld [vmem:[#allocation7 + $0x28] sm:$0xff]  ;;  %v190_v17 = vld [vmem:[#allocation7 + $0x20] sm:$0xff] }
  0x42   :  { %550 = vmatprep.subr.mxu0 %v809_v0  ;;  %561 = vmatprep.subr.mxu1 %v809_v0  ;;  %v189_v18 = vld [vmem:[#allocation7 + $0x18] sm:$0xff]  ;;  %v188_v19 = vld [vmem:[#allocation7 + $0x10] sm:$0xff]  ;;  %v187_v20 = vld [vmem:[#allocation7 + $0x8] sm:$0xff]  ;;  %p781_p0 = por %p780_p13, %p779_p12 }
  0x43   :  { %551 = vmatpush3.msra.mxu0 %v101_v4  ;;  %562 = vmatpush3.msra.mxu1 %v199_v6  ;;  %v186_v21 = vld [vmem:[#allocation7] sm:$0xff]  ;;  %v295_v22 = vld [vmem:[#allocation8 + $0x78] sm:$0xff]  ;;  %v294_v23 = vld [vmem:[#allocation8 + $0x70] sm:$0xff] }
  0x44   :  { %552 = vmatprep.subr.mxu0 %v809_v0  ;;  %563 = vmatprep.subr.mxu1 %v809_v0  ;;  %v293_v24 = vld [vmem:[#allocation8 + $0x68] sm:$0xff]  ;;  %v292_v25 = vld [vmem:[#allocation8 + $0x60] sm:$0xff]  ;;  %v291_v26 = vld [vmem:[#allocation8 + $0x58] sm:$0xff]  ;;  %p782_p1 = pnand %p781_p0, %p775_p11 }
  0x45   :  { %553 = vmatpush3.msra.mxu0 %v100_v7  ;;  %564 = vmatpush3.msra.mxu1 %v198_v9  ;;  %v290_v27 = vld [vmem:[#allocation8 + $0x50] sm:$0xff]  ;;  %v289_v28 = vld [vmem:[#allocation8 + $0x48] sm:$0xff]  ;;  %v485_v29 = vld [vmem:[%s966_s2] ss:$0 sm:$0xff] }
  0x46   :  { %555 = vmatmul.mubr.msk.f32.vlgmr.msra.gmra.mxu0 %vm111_vm1, %v99_v8  ;;  %565 = vmatprep.subr.mxu1 %v809_v0  ;;  %v288_v34 = vld [vmem:[#allocation8 + $0x40] sm:$0xff]  ;;  %v287_v35 = vld [vmem:[#allocation8 + $0x38] sm:$0xff]  ;;  %v286_v36 = vld [vmem:[#allocation8 + $0x30] sm:$0xff] }
  0x47   :  { %592 = vmatprep.subr.mxu0 %v809_v0  ;;  %566 = vmatpush3.msra.mxu1 %v197_v10  ;;  %v285_v37 = vld [vmem:[#allocation8 + $0x28] sm:$0xff]  ;;  %v284_v38 = vld [vmem:[#allocation8 + $0x20] sm:$0xff]  ;;  %v283_v39 = vld [vmem:[#allocation8 + $0x18] sm:$0xff] }
  0x48   :  { %624 = vmatprep.mubr.msk.f32.mxu0 %vm810_vm0, %v809_v0  ;;  %567 = vmatprep.subr.mxu1 %v809_v0  ;;  %v282_v40 = vld [vmem:[#allocation8 + $0x10] sm:$0xff]  ;;  %v281_v41 = vld [vmem:[#allocation8 + $0x8] sm:$0xff]  ;;  %v280_v42 = vld [vmem:[#allocation8] sm:$0xff] }
  0x49   :  { %568 = vmatpush3.msra.mxu1 %v196_v11  ;;  %593 = vmatpush3.msra.mxu0 %v295_v22  ;;  %v389_v43 = vld [vmem:[#allocation10 + $0x78] sm:$0xff]  ;;  %v388_v44 = vld [vmem:[#allocation10 + $0x70] sm:$0xff]  ;;  %v387_v45 = vld [vmem:[#allocation10 + $0x68] sm:$0xff] }
  0x4a   :  { %569 = vmatprep.subr.mxu1 %v809_v0  ;;  %594 = vmatprep.subr.mxu0 %v809_v0  ;;  %v386_v46 = vld [vmem:[#allocation10 + $0x60] sm:$0xff]  ;;  %v385_v47 = vld [vmem:[#allocation10 + $0x58] sm:$0xff]  ;;  %v384_v48 = vld [vmem:[#allocation10 + $0x50] sm:$0xff] }
  0x4b   :  { %570 = vmatpush3.msra.mxu1 %v195_v12  ;;  %595 = vmatpush3.msra.mxu0 %v294_v23  ;;  %v383_v49 = vld [vmem:[#allocation10 + $0x48] sm:$0xff]  ;;  %v382_v50 = vld [vmem:[#allocation10 + $0x40] sm:$0xff]  ;;  %v381_v51 = vld [vmem:[#allocation10 + $0x38] sm:$0xff] }
  0x4c   :  { %571 = vmatprep.subr.mxu1 %v809_v0  ;;  %596 = vmatprep.subr.mxu0 %v809_v0  ;;  %v380_v52 = vld [vmem:[#allocation10 + $0x30] sm:$0xff]  ;;  %v379_v53 = vld [vmem:[#allocation10 + $0x28] sm:$0xff]  ;;  %v378_v54 = vld [vmem:[#allocation10 + $0x20] sm:$0xff] }
  0x4d   :  { %572 = vmatpush3.msra.mxu1 %v194_v13  ;;  %597 = vmatpush3.msra.mxu0 %v293_v24  ;;  %v377_v55 = vld [vmem:[#allocation10 + $0x18] sm:$0xff]  ;;  %v376_v61 = vld [vmem:[#allocation10 + $0x10] sm:$0xff]  ;;  %v375_v62 = vld [vmem:[#allocation10 + $0x8] sm:$0xff] }
  0x4e   :  { %573 = vmatprep.subr.mxu1 %v809_v0  ;;  %598 = vmatprep.subr.mxu0 %v809_v0  ;;  %v487_v56 = vld [vmem:[%s968_s4] ss:$0 sm:$0xff]  ;;  %v374_v63 = vld [vmem:[#allocation10] sm:$0xff] }
  0x4f   :  { %574 = vmatpush3.msra.mxu1 %v193_v14  ;;  %599 = vmatpush3.msra.mxu0 %v292_v25  ;;  %v488_v1 = vld [vmem:[%s970_s6] ss:$0 sm:$0xff] }
  0x50   :  { %575 = vmatprep.subr.mxu1 %v809_v0  ;;  %600 = vmatprep.subr.mxu0 %v809_v0  ;;  %v489_v6 = vld [vmem:[%s972_s8] ss:$0 sm:$0xff] }
  0x51   :  { %576 = vmatpush3.msra.mxu1 %v192_v15  ;;  %601 = vmatpush3.msra.mxu0 %v291_v26 }
  0x52   :  { %577 = vmatprep.subr.mxu1 %v809_v0  ;;  %602 = vmatprep.subr.mxu0 %v809_v0 }
  0x53   :  { %578 = vmatpush3.msra.mxu1 %v191_v16  ;;  %603 = vmatpush3.msra.mxu0 %v290_v27 }
  0x54   :  { %579 = vmatprep.subr.mxu1 %v809_v0  ;;  %604 = vmatprep.subr.mxu0 %v809_v0 }
  0x55   :  { %580 = vmatpush3.msra.mxu1 %v190_v17  ;;  %605 = vmatpush3.msra.mxu0 %v289_v28 }
  0x56   :  { %581 = vmatprep.subr.mxu1 %v809_v0  ;;  %606 = vmatprep.subr.mxu0 %v809_v0 }
  0x57   :  { %582 = vmatpush3.msra.mxu1 %v189_v18  ;;  %607 = vmatpush3.msra.mxu0 %v288_v34 }
  0x58   :  { %583 = vmatprep.subr.mxu1 %v809_v0  ;;  %608 = vmatprep.subr.mxu0 %v809_v0 }
  0x59   :  { %584 = vmatpush3.msra.mxu1 %v188_v19  ;;  %609 = vmatpush3.msra.mxu0 %v287_v35 }
  0x5a   :  { %585 = vmatprep.subr.mxu1 %v809_v0  ;;  %610 = vmatprep.subr.mxu0 %v809_v0 }
  0x5b   :  { %586 = vmatpush3.msra.mxu1 %v187_v20  ;;  %611 = vmatpush3.msra.mxu0 %v286_v36 }
  0x5c   :  { %587 = vmatprep.subr.mxu1 %v809_v0  ;;  %612 = vmatprep.subr.mxu0 %v809_v0 }
  0x5d   :  { %588 = vmatpush3.msra.mxu1 %v186_v21  ;;  %613 = vmatpush3.msra.mxu0 %v285_v37 }
  0x5e   :  { %627 = vmatprep.subr.mxu1 %v809_v0  ;;  %614 = vmatprep.subr.mxu0 %v809_v0 }
  0x5f   :  { %615 = vmatpush3.msra.mxu0 %v284_v38 }
  0x60   :  { %616 = vmatprep.subr.mxu0 %v809_v0 }
  0x61   :  { %617 = vmatpush3.msra.mxu0 %v283_v39 }
  0x62   :  { %618 = vmatprep.subr.mxu0 %v809_v0 }
  0x63   :  { %619 = vmatpush3.msra.mxu0 %v282_v40 }
  0x64   :  { %620 = vmatprep.subr.mxu0 %v809_v0 }
  0x65   :  { %621 = vmatpush3.msra.mxu0 %v281_v41 }
  0x66   :  { %622 = vmatprep.subr.mxu0 %v809_v0 }
  0x67   :  { %623 = vmatpush3.msra.mxu0 %v280_v42 }
 0x106   :  { %v181_v30 = vpop.f32.mrf.mxu0 }
 0x107   :  { %v182_v31 = vadd.f32 %v485_v29, %v181_v30 }
 0x108   :  { %v556_v32 = vpop.f32.mrf.mxu0 }
 0x109   :  { %v185_v33 = vmax.f32 %v182_v31, 0.0 }
 0x10b   :  { %590 = vmatmul.mubr.f32.vlgmr.msra.gmra.mxu1 %v185_v33 }
 0x10c   :  { %659 = vmatprep.mubr.msk.f32.mxu1 %vm810_vm0, %v809_v0  ;;  %628 = vmatpush3.msra.mxu1 %v389_v43 }
 0x10d   :  { %629 = vmatprep.subr.mxu1 %v809_v0 }
 0x10e   :  { %630 = vmatpush3.msra.mxu1 %v388_v44 }
 0x10f   :  { %631 = vmatprep.subr.mxu1 %v809_v0 }
 0x110   :  { %632 = vmatpush3.msra.mxu1 %v387_v45 }
 0x111   :  { %633 = vmatprep.subr.mxu1 %v809_v0 }
 0x112   :  { %634 = vmatpush3.msra.mxu1 %v386_v46 }
 0x113   :  { %635 = vmatprep.subr.mxu1 %v809_v0 }
 0x114   :  { %636 = vmatpush3.msra.mxu1 %v385_v47 }
 0x115   :  { %637 = vmatprep.subr.mxu1 %v809_v0 }
 0x116   :  { %638 = vmatpush3.msra.mxu1 %v384_v48 }
 0x117   :  { %639 = vmatprep.subr.mxu1 %v809_v0 }
 0x118   :  { %640 = vmatpush3.msra.mxu1 %v383_v49 }
 0x119   :  { %641 = vmatprep.subr.mxu1 %v809_v0 }
 0x11a   :  { %642 = vmatpush3.msra.mxu1 %v382_v50 }
 0x11b   :  { %643 = vmatprep.subr.mxu1 %v809_v0 }
 0x11c   :  { %644 = vmatpush3.msra.mxu1 %v381_v51 }
 0x11d   :  { %645 = vmatprep.subr.mxu1 %v809_v0 }
 0x11e   :  { %646 = vmatpush3.msra.mxu1 %v380_v52 }
 0x11f   :  { %647 = vmatprep.subr.mxu1 %v809_v0 }
 0x120   :  { %648 = vmatpush3.msra.mxu1 %v379_v53 }
 0x121   :  { %649 = vmatprep.subr.mxu1 %v809_v0 }
 0x122   :  { %650 = vmatpush3.msra.mxu1 %v378_v54 }
 0x123   :  { %651 = vmatprep.subr.mxu1 %v809_v0 }
 0x124   :  { %652 = vmatpush3.msra.mxu1 %v377_v55 }
 0x125   :  { %653 = vmatprep.subr.mxu1 %v809_v0 }
 0x126   :  { %654 = vmatpush3.msra.mxu1 %v376_v61 }
 0x127   :  { %655 = vmatprep.subr.mxu1 %v809_v0 }
 0x128   :  { %656 = vmatpush3.msra.mxu1 %v375_v62 }
 0x129   :  { %657 = vmatprep.subr.mxu1 %v809_v0 }
 0x12a   :  { %658 = vmatpush3.msra.mxu1 %v374_v63 }
 0x1cb   :  { %v275_v57 = vpop.f32.mrf.mxu1 }
 0x1cc   :  { %v276_v58 = vadd.f32 %v487_v56, %v275_v57 }
 0x1cd   :  { %v591_v59 = vpop.f32.mrf.mxu1 }
 0x1ce   :  { %672 = vtanh.f32 %v276_v58 }
 0x1db   :  { %v673_v60 = vpop.eup %672 }
 0x1dc   :  { %625 = vmatmul.mubr.f32.vlgmr.msra.gmra.mxu0 %v673_v60 }
 0x29c   :  { %v369_v2 = vpop.f32.mrf.mxu0 }
 0x29d   :  { %v370_v3 = vadd.f32 %v488_v1, %v369_v2 }
 0x29e   :  { %v626_v4 = vpop.f32.mrf.mxu0 }
 0x29f   :  { %v373_v5 = vmax.f32 %v370_v3, 0.0 }
 0x2a1   :  { %660 = vmatmul.mubr.f32.vlgmr.msra.gmra.mxu1 %v373_v5 }
 0x361   :  { %v463_v7 = vpop.f32.mrf.mxu1 }
 0x362   :  { %v464_v8 = vadd.f32 %v489_v6, %v463_v7 }
 0x363   :  { %v661_v0 = vpop.f32.mrf.mxu1 }
 0x364   :  { %467 = vst [vmem:[#allocation11] sm:$0xff] %v464_v8 }
 0x365   :  { %785 = shalt.err (!%p782_p1)
}
 0x366   :  { %477 = dma.vmem_to_hbm [thread:$0]  %s475_s17, 128, %s973_s9, [#allocation4]  }
 0x367   :  { %800 = dma.done.wait [#allocation4], 128  }
 0x368   :  { %801 = vsyncadd [#allocation4], 4294967168 }
 0x369   :  { %481 = vsyncpa [#allocation3], 1 }
 0x36a   :  { %482 = vsyncpa [#allocation6], 1 }
 0x36b   :  { %483 = vsyncpa [#allocation9], 1 }
 0x36c   :  { %484 = vsyncpa [#allocation4], 1 }

// kernel: net_forward.1
= control target key start
LH: loop header
LB: loop body
LE: loop exit
PB: predicated region body
PF: predicated region fallthrough
CT: control target
= control target key end

     0   :  { %14 = vsyncpa [#allocation3], 0  ;;  %s964_s0 = inlined_call_operand.hbm [shape: f32[8,32], index: 0, kind: input, shape index: {}]   ;;  %s965_s1 = inlined_call_operand.hbm [shape: f32[32,128], index: 1, kind: input, shape index: {}]   ;;  %s966_s2 = inlined_call_operand.vmem [shape: f32[1,128], index: 2, kind: input, shape index: {}]   ;;  %s967_s3 = inlined_call_operand.hbm [shape: f32[128,128], index: 3, kind: input, shape index: {}]   ;;  %s968_s4 = inlined_call_operand.vmem [shape: f32[1,128], index: 4, kind: input, shape index: {}]   ;;  %s969_s5 = inlined_call_operand.hbm [shape: f32[128,128], index: 5, kind: input, shape index: {}]   ;;  %s970_s6 = inlined_call_operand.vmem [shape: f32[1,128], index: 6, kind: input, shape index: {}]   ;;  %s971_s7 = inlined_call_operand.hbm [shape: f32[128,128], index: 7, kind: input, shape index: {}]   ;;  %s972_s8 = inlined_call_operand.vmem [shape: f32[1,128], index: 8, kind: input, shape index: {}]   ;;  %s973_s9 = inlined_call_operand.hbm [shape: f32[8,128], index: 9, kind: output, shape index: {}]  }
   0x1   :  { %15 = vsyncpa [#allocation6], 0 }
   0x2   :  { %16 = vsyncpa [#allocation9], 0 }
   0x3   :  { %17 = vsyncpa [#allocation4], 0  ;;  %s802_s30 = smov [#allocation5]  }
   0x4   :  { %s33_s10 = sshll.u32 %s802_s30, 4  ;;  %s34_s10 = int_to_ptr.vmem [resolvable:$true] %s33_s10 }
   0x5   :  { %s682_s11 = scalar_lea.vmem %s34_s10, 512  ;;  %p687_p1 = scmp.lt.s32.totalorder %s34_s10, %s34_s10 }
   0x6   :  { %p683_p0 = scmp.ne.s32.totalorder %s34_s10, %s682_s11  ;;  %p688_p2 = scmp.lt.s32.totalorder %s682_s11, %s682_s11 }
   0x8   :  { %p689_p3 = por %p688_p2, %p687_p1 }
   0xa   :  { %p690_p4 = pnand %p689_p3, %p683_p0 }
   0xc   :  { %693 = shalt.err (!%p690_p4)
}
   0xd   :  { %s803_s12 = smov 128   ;;  %s804_s13 = smov 8  }
   0xe   :  { %39 = dma.hbm_to_vmem [thread:$0]  %s965_s1, 512, %s34_s10, [#allocation6], %s803_s12, %s803_s12, %s804_s13  }
   0xf   :  { %s805_s16 = smov [#allocation8]   ;;  %s806_s18 = smov [#allocation2]  }
  0x10   :  { %s61_s17 = sshll.u32 %s805_s16, 4  ;;  %s24_s19 = sshll.u32 %s806_s18, 4  ;;  %s62_s17 = int_to_ptr.vmem [resolvable:$true] %s61_s17  ;;  %s25_s19 = int_to_ptr.vmem [resolvable:$true] %s24_s19 }
  0x11   :  { %s702_s20 = scalar_lea.vmem %s62_s17, 2048  ;;  %p707_p6 = scmp.lt.s32.totalorder %s62_s17, %s62_s17 }
  0x12   :  { %p703_p5 = scmp.ne.s32.totalorder %s62_s17, %s702_s20  ;;  %p708_p7 = scmp.lt.s32.totalorder %s702_s20, %s702_s20 }
  0x14   :  { %p709_p8 = por %p708_p7, %p707_p6 }
  0x16   :  { %p710_p9 = pnand %p709_p8, %p703_p5 }
  0x18   :  { %713 = shalt.err (!%p710_p9)
}
  0x19   :  { %67 = dma.hbm_to_vmem [thread:$0]  %s969_s5, 2048, %s62_s17, [#allocation9], %s803_s12, %s803_s12, %s804_s13  }
  0x1a   :  { %s722_s1 = scalar_lea.vmem %s25_s19, 128  ;;  %p727_p11 = scmp.lt.s32.totalorder %s25_s19, %s25_s19 }
  0x1b   :  { %p723_p10 = scmp.ne.s32.totalorder %s25_s19, %s722_s1  ;;  %p728_p12 = scmp.lt.s32.totalorder %s722_s1, %s722_s1 }
  0x1d   :  { %p729_p13 = por %p728_p12, %p727_p11 }
  0x1f   :  { %p730_p0 = pnand %p729_p13, %p723_p10 }
  0x21   :  { %733 = shalt.err (!%p730_p0)
}
  0x22   :  { %27 = dma.hbm_to_vmem [thread:$0]  %s964_s0, 128, %s25_s19, [#allocation3]  }
  0x23   :  { %s807_s25 = smov [#allocation7]   ;;  %s808_s27 = smov [#allocation10]  }
  0x24   :  { %s47_s26 = sshll.u32 %s807_s25, 4  ;;  %s75_s28 = sshll.u32 %s808_s27, 4  ;;  %s48_s26 = int_to_ptr.vmem [resolvable:$true] %s47_s26  ;;  %s76_s28 = int_to_ptr.vmem [resolvable:$true] %s75_s28 }
  0x25   :  { %s742_s29 = scalar_lea.vmem %s48_s26, 2048  ;;  %p747_p2 = scmp.lt.s32.totalorder %s48_s26, %s48_s26 }
  0x26   :  { %p743_p1 = scmp.ne.s32.totalorder %s48_s26, %s742_s29  ;;  %p748_p3 = scmp.lt.s32.totalorder %s742_s29, %s742_s29 }
  0x28   :  { %p749_p4 = por %p748_p3, %p747_p2 }
  0x2a   :  { %p750_p5 = pnand %p749_p4, %p743_p1 }
  0x2c   :  { %753 = shalt.err (!%p750_p5)
}
  0x2d   :  { %53 = dma.hbm_to_vmem [thread:$0]  %s967_s3, 2048, %s48_s26, [#allocation6], %s803_s12, %s803_s12, %s804_s13  }
  0x2e   :  { %s762_s0 = scalar_lea.vmem %s76_s28, 2048  ;;  %p767_p7 = scmp.lt.s32.totalorder %s76_s28, %s76_s28 }
  0x2f   :  { %p763_p6 = scmp.ne.s32.totalorder %s76_s28, %s762_s0  ;;  %p768_p8 = scmp.lt.s32.totalorder %s762_s0, %s762_s0 }
  0x31   :  { %p769_p9 = por %p768_p8, %p767_p7 }
  0x33   :  { %p770_p10 = pnand %p769_p9, %p763_p6 }
  0x35   :  { %773 = shalt.err (!%p770_p10)
}
  0x36   :  { %81 = dma.hbm_to_vmem [thread:$0]  %s971_s7, 2048, %s76_s28, [#allocation9], %s803_s12, %s803_s12, %s804_s13  }
  0x37   :  { %794 = dma.done.wait [#allocation3], 128  }
  0x38   :  { %795 = vsyncadd [#allocation3], 4294967168 }
  0x39   :  { %796 = dma.done.wait [#allocation6], 2560  }
  0x3a   :  { %797 = vsyncadd [#allocation6], 4294964736 }
  0x3b   :  { %798 = dma.done.wait [#allocation9], 4096  }
  0x3c   :  { %799 = vsyncadd [#allocation9], 4294963200  ;;  %v809_v0 = vmov 0.0   ;;  %vm810_vm0 = vmmov 0   ;;  %v103_v1 = vld [vmem:[#allocation5 + $0x18] sm:$0xff]  ;;  %v102_v2 = vld [vmem:[#allocation5 + $0x10] sm:$0xff] }
  0x3d   :  { %546 = vmatprep.subr.mxu0 %v809_v0  ;;  %554 = vmatprep.mubr.msk.f32.mxu0 %vm810_vm0, %v809_v0  ;;  %v201_v3 = vld [vmem:[#allocation7 + $0x78] sm:$0xff]  ;;  %v101_v4 = vld [vmem:[#allocation5 + $0x8] sm:$0xff]  ;;  %v200_v5 = vld [vmem:[#allocation7 + $0x70] sm:$0xff]  ;;  %vm111_vm1 = vcmask 261120   ;;  %s811_s16 = smov [#allocation11]  }
  0x3e   :  { %557 = vmatprep.subr.mxu1 %v809_v0  ;;  %589 = vmatprep.mubr.msk.f32.mxu1 %vm810_vm0, %v809_v0  ;;  %v199_v6 = vld [vmem:[#allocation7 + $0x68] sm:$0xff]  ;;  %v100_v7 = vld [vmem:[#allocation5] sm:$0xff]  ;;  %v99_v8 = vld [vmem:[#allocation2] sm:$0xff]  ;;  %s474_s17 = sshll.u32 %s811_s16, 4  ;;  %s475_s17 = int_to_ptr.vmem [resolvable:$true] %s474_s17 }
  0x3f   :  { %547 = vmatpush3.msra.mxu0 %v103_v1  ;;  %558 = vmatpush3.msra.mxu1 %v201_v3  ;;  %v198_v9 = vld [vmem:[#allocation7 + $0x60] sm:$0xff]  ;;  %v197_v10 = vld [vmem:[#allocation7 + $0x58] sm:$0xff]  ;;  %v196_v11 = vld [vmem:[#allocation7 + $0x50] sm:$0xff]  ;;  %s774_s18 = scalar_lea.vmem %s475_s17, 128  ;;  %p779_p12 = scmp.lt.s32.totalorder %s475_s17, %s475_s17 }
  0x40   :  { %548 = vmatprep.subr.mxu0 %v809_v0  ;;  %559 = vmatprep.subr.mxu1 %v809_v0  ;;  %v195_v12 = vld [vmem:[#allocation7 + $0x48] sm:$0xff]  ;;  %v194_v13 = vld [vmem:[#allocation7 + $0x40] sm:$0xff]  ;;  %v193_v14 = vld [vmem:[#allocation7 + $0x38] sm:$0xff]  ;;  %p775_p11 = scmp.ne.s32.totalorder %s475_s17, %s774_s18  ;;  %p780_p13 = scmp.lt.s32.totalorder %s774_s18, %s774_s18 }
  0x41   :  { %549 = vmatpush3.msra.mxu0 %v102_v2  ;;  %560 = vmatpush3.msra.mxu1 %v200_v5  ;;  %v192_v15 = vld [vmem:[#allocation7 + $0x30] sm:$0xff]  ;;  %v191_v16 = vld [vmem:[#allocation7 + $0x28] sm:$0xff]  ;;  %v190_v17 = vld [vmem:[#allocation7 + $0x20] sm:$0xff] }
  0x42   :  { %550 = vmatprep.subr.mxu0 %v809_v0  ;;  %561 = vmatprep.subr.mxu1 %v809_v0  ;;  %v189_v18 = vld [vmem:[#allocation7 + $0x18] sm:$0xff]  ;;  %v188_v19 = vld [vmem:[#allocation7 + $0x10] sm:$0xff]  ;;  %v187_v20 = vld [vmem:[#allocation7 + $0x8] sm:$0xff]  ;;  %p781_p0 = por %p780_p13, %p779_p12 }
  0x43   :  { %551 = vmatpush3.msra.mxu0 %v101_v4  ;;  %562 = vmatpush3.msra.mxu1 %v199_v6  ;;  %v186_v21 = vld [vmem:[#allocation7] sm:$0xff]  ;;  %v295_v22 = vld [vmem:[#allocation8 + $0x78] sm:$0xff]  ;;  %v294_v23 = vld [vmem:[#allocation8 + $0x70] sm:$0xff] }
  0x44   :  { %552 = vmatprep.subr.mxu0 %v809_v0  ;;  %563 = vmatprep.subr.mxu1 %v809_v0  ;;  %v293_v24 = vld [vmem:[#allocation8 + $0x68] sm:$0xff]  ;;  %v292_v25 = vld [vmem:[#allocation8 + $0x60] sm:$0xff]  ;;  %v291_v26 = vld [vmem:[#allocation8 + $0x58] sm:$0xff]  ;;  %p782_p1 = pnand %p781_p0, %p775_p11 }
  0x45   :  { %553 = vmatpush3.msra.mxu0 %v100_v7  ;;  %564 = vmatpush3.msra.mxu1 %v198_v9  ;;  %v290_v27 = vld [vmem:[#allocation8 + $0x50] sm:$0xff]  ;;  %v289_v28 = vld [vmem:[#allocation8 + $0x48] sm:$0xff]  ;;  %v485_v29 = vld [vmem:[%s966_s2] ss:$0 sm:$0xff] }
  0x46   :  { %555 = vmatmul.mubr.msk.f32.vlgmr.msra.gmra.mxu0 %vm111_vm1, %v99_v8  ;;  %565 = vmatprep.subr.mxu1 %v809_v0  ;;  %v288_v34 = vld [vmem:[#allocation8 + $0x40] sm:$0xff]  ;;  %v287_v35 = vld [vmem:[#allocation8 + $0x38] sm:$0xff]  ;;  %v286_v36 = vld [vmem:[#allocation8 + $0x30] sm:$0xff] }
  0x47   :  { %592 = vmatprep.subr.mxu0 %v809_v0  ;;  %566 = vmatpush3.msra.mxu1 %v197_v10  ;;  %v285_v37 = vld [vmem:[#allocation8 + $0x28] sm:$0xff]  ;;  %v284_v38 = vld [vmem:[#allocation8 + $0x20] sm:$0xff]  ;;  %v283_v39 = vld [vmem:[#allocation8 + $0x18] sm:$0xff] }
  0x48   :  { %624 = vmatprep.mubr.msk.f32.mxu0 %vm810_vm0, %v809_v0  ;;  %567 = vmatprep.subr.mxu1 %v809_v0  ;;  %v282_v40 = vld [vmem:[#allocation8 + $0x10] sm:$0xff]  ;;  %v281_v41 = vld [vmem:[#allocation8 + $0x8] sm:$0xff]  ;;  %v280_v42 = vld [vmem:[#allocation8] sm:$0xff] }
  0x49   :  { %568 = vmatpush3.msra.mxu1 %v196_v11  ;;  %593 = vmatpush3.msra.mxu0 %v295_v22  ;;  %v389_v43 = vld [vmem:[#allocation10 + $0x78] sm:$0xff]  ;;  %v388_v44 = vld [vmem:[#allocation10 + $0x70] sm:$0xff]  ;;  %v387_v45 = vld [vmem:[#allocation10 + $0x68] sm:$0xff] }
  0x4a   :  { %569 = vmatprep.subr.mxu1 %v809_v0  ;;  %594 = vmatprep.subr.mxu0 %v809_v0  ;;  %v386_v46 = vld [vmem:[#allocation10 + $0x60] sm:$0xff]  ;;  %v385_v47 = vld [vmem:[#allocation10 + $0x58] sm:$0xff]  ;;  %v384_v48 = vld [vmem:[#allocation10 + $0x50] sm:$0xff] }
  0x4b   :  { %570 = vmatpush3.msra.mxu1 %v195_v12  ;;  %595 = vmatpush3.msra.mxu0 %v294_v23  ;;  %v383_v49 = vld [vmem:[#allocation10 + $0x48] sm:$0xff]  ;;  %v382_v50 = vld [vmem:[#allocation10 + $0x40] sm:$0xff]  ;;  %v381_v51 = vld [vmem:[#allocation10 + $0x38] sm:$0xff] }
  0x4c   :  { %571 = vmatprep.subr.mxu1 %v809_v0  ;;  %596 = vmatprep.subr.mxu0 %v809_v0  ;;  %v380_v52 = vld [vmem:[#allocation10 + $0x30] sm:$0xff]  ;;  %v379_v53 = vld [vmem:[#allocation10 + $0x28] sm:$0xff]  ;;  %v378_v54 = vld [vmem:[#allocation10 + $0x20] sm:$0xff] }
  0x4d   :  { %572 = vmatpush3.msra.mxu1 %v194_v13  ;;  %597 = vmatpush3.msra.mxu0 %v293_v24  ;;  %v377_v55 = vld [vmem:[#allocation10 + $0x18] sm:$0xff]  ;;  %v376_v61 = vld [vmem:[#allocation10 + $0x10] sm:$0xff]  ;;  %v375_v62 = vld [vmem:[#allocation10 + $0x8] sm:$0xff] }
  0x4e   :  { %573 = vmatprep.subr.mxu1 %v809_v0  ;;  %598 = vmatprep.subr.mxu0 %v809_v0  ;;  %v487_v56 = vld [vmem:[%s968_s4] ss:$0 sm:$0xff]  ;;  %v374_v63 = vld [vmem:[#allocation10] sm:$0xff] }
  0x4f   :  { %574 = vmatpush3.msra.mxu1 %v193_v14  ;;  %599 = vmatpush3.msra.mxu0 %v292_v25  ;;  %v488_v1 = vld [vmem:[%s970_s6] ss:$0 sm:$0xff] }
  0x50   :  { %575 = vmatprep.subr.mxu1 %v809_v0  ;;  %600 = vmatprep.subr.mxu0 %v809_v0  ;;  %v489_v6 = vld [vmem:[%s972_s8] ss:$0 sm:$0xff] }
  0x51   :  { %576 = vmatpush3.msra.mxu1 %v192_v15  ;;  %601 = vmatpush3.msra.mxu0 %v291_v26 }
  0x52   :  { %577 = vmatprep.subr.mxu1 %v809_v0  ;;  %602 = vmatprep.subr.mxu0 %v809_v0 }
  0x53   :  { %578 = vmatpush3.msra.mxu1 %v191_v16  ;;  %603 = vmatpush3.msra.mxu0 %v290_v27 }
  0x54   :  { %579 = vmatprep.subr.mxu1 %v809_v0  ;;  %604 = vmatprep.subr.mxu0 %v809_v0 }
  0x55   :  { %580 = vmatpush3.msra.mxu1 %v190_v17  ;;  %605 = vmatpush3.msra.mxu0 %v289_v28 }
  0x56   :  { %581 = vmatprep.subr.mxu1 %v809_v0  ;;  %606 = vmatprep.subr.mxu0 %v809_v0 }
  0x57   :  { %582 = vmatpush3.msra.mxu1 %v189_v18  ;;  %607 = vmatpush3.msra.mxu0 %v288_v34 }
  0x58   :  { %583 = vmatprep.subr.mxu1 %v809_v0  ;;  %608 = vmatprep.subr.mxu0 %v809_v0 }
  0x59   :  { %584 = vmatpush3.msra.mxu1 %v188_v19  ;;  %609 = vmatpush3.msra.mxu0 %v287_v35 }
  0x5a   :  { %585 = vmatprep.subr.mxu1 %v809_v0  ;;  %610 = vmatprep.subr.mxu0 %v809_v0 }
  0x5b   :  { %586 = vmatpush3.msra.mxu1 %v187_v20  ;;  %611 = vmatpush3.msra.mxu0 %v286_v36 }
  0x5c   :  { %587 = vmatprep.subr.mxu1 %v809_v0  ;;  %612 = vmatprep.subr.mxu0 %v809_v0 }
  0x5d   :  { %588 = vmatpush3.msra.mxu1 %v186_v21  ;;  %613 = vmatpush3.msra.mxu0 %v285_v37 }
  0x5e   :  { %627 = vmatprep.subr.mxu1 %v809_v0  ;;  %614 = vmatprep.subr.mxu0 %v809_v0 }
  0x5f   :  { %615 = vmatpush3.msra.mxu0 %v284_v38 }
  0x60   :  { %616 = vmatprep.subr.mxu0 %v809_v0 }
  0x61   :  { %617 = vmatpush3.msra.mxu0 %v283_v39 }
  0x62   :  { %618 = vmatprep.subr.mxu0 %v809_v0 }
  0x63   :  { %619 = vmatpush3.msra.mxu0 %v282_v40 }
  0x64   :  { %620 = vmatprep.subr.mxu0 %v809_v0 }
  0x65   :  { %621 = vmatpush3.msra.mxu0 %v281_v41 }
  0x66   :  { %622 = vmatprep.subr.mxu0 %v809_v0 }
  0x67   :  { %623 = vmatpush3.msra.mxu0 %v280_v42 }
 0x106   :  { %v181_v30 = vpop.f32.mrf.mxu0 }
 0x107   :  { %v182_v31 = vadd.f32 %v485_v29, %v181_v30 }
 0x108   :  { %v556_v32 = vpop.f32.mrf.mxu0 }
 0x109   :  { %v185_v33 = vmax.f32 %v182_v31, 0.0 }
 0x10b   :  { %590 = vmatmul.mubr.f32.vlgmr.msra.gmra.mxu1 %v185_v33 }
 0x10c   :  { %659 = vmatprep.mubr.msk.f32.mxu1 %vm810_vm0, %v809_v0  ;;  %628 = vmatpush3.msra.mxu1 %v389_v43 }
 0x10d   :  { %629 = vmatprep.subr.mxu1 %v809_v0 }
 0x10e   :  { %630 = vmatpush3.msra.mxu1 %v388_v44 }
 0x10f   :  { %631 = vmatprep.subr.mxu1 %v809_v0 }
 0x110   :  { %632 = vmatpush3.msra.mxu1 %v387_v45 }
 0x111   :  { %633 = vmatprep.subr.mxu1 %v809_v0 }
 0x112   :  { %634 = vmatpush3.msra.mxu1 %v386_v46 }
 0x113   :  { %635 = vmatprep.subr.mxu1 %v809_v0 }
 0x114   :  { %636 = vmatpush3.msra.mxu1 %v385_v47 }
 0x115   :  { %637 = vmatprep.subr.mxu1 %v809_v0 }
 0x116   :  { %638 = vmatpush3.msra.mxu1 %v384_v48 }
 0x117   :  { %639 = vmatprep.subr.mxu1 %v809_v0 }
 0x118   :  { %640 = vmatpush3.msra.mxu1 %v383_v49 }
 0x119   :  { %641 = vmatprep.subr.mxu1 %v809_v0 }
 0x11a   :  { %642 = vmatpush3.msra.mxu1 %v382_v50 }
 0x11b   :  { %643 = vmatprep.subr.mxu1 %v809_v0 }
 0x11c   :  { %644 = vmatpush3.msra.mxu1 %v381_v51 }
 0x11d   :  { %645 = vmatprep.subr.mxu1 %v809_v0 }
 0x11e   :  { %646 = vmatpush3.msra.mxu1 %v380_v52 }
 0x11f   :  { %647 = vmatprep.subr.mxu1 %v809_v0 }
 0x120   :  { %648 = vmatpush3.msra.mxu1 %v379_v53 }
 0x121   :  { %649 = vmatprep.subr.mxu1 %v809_v0 }
 0x122   :  { %650 = vmatpush3.msra.mxu1 %v378_v54 }
 0x123   :  { %651 = vmatprep.subr.mxu1 %v809_v0 }
 0x124   :  { %652 = vmatpush3.msra.mxu1 %v377_v55 }
 0x125   :  { %653 = vmatprep.subr.mxu1 %v809_v0 }
 0x126   :  { %654 = vmatpush3.msra.mxu1 %v376_v61 }
 0x127   :  { %655 = vmatprep.subr.mxu1 %v809_v0 }
 0x128   :  { %656 = vmatpush3.msra.mxu1 %v375_v62 }
 0x129   :  { %657 = vmatprep.subr.mxu1 %v809_v0 }
 0x12a   :  { %658 = vmatpush3.msra.mxu1 %v374_v63 }
 0x1cb   :  { %v275_v57 = vpop.f32.mrf.mxu1 }
 0x1cc   :  { %v276_v58 = vadd.f32 %v487_v56, %v275_v57 }
 0x1cd   :  { %v591_v59 = vpop.f32.mrf.mxu1 }
 0x1ce   :  { %672 = vtanh.f32 %v276_v58 }
 0x1db   :  { %v673_v60 = vpop.eup %672 }
 0x1dc   :  { %625 = vmatmul.mubr.f32.vlgmr.msra.gmra.mxu0 %v673_v60 }
 0x29c   :  { %v369_v2 = vpop.f32.mrf.mxu0 }
 0x29d   :  { %v370_v3 = vadd.f32 %v488_v1, %v369_v2 }
 0x29e   :  { %v626_v4 = vpop.f32.mrf.mxu0 }
 0x29f   :  { %v373_v5 = vmax.f32 %v370_v3, 0.0 }
 0x2a1   :  { %660 = vmatmul.mubr.f32.vlgmr.msra.gmra.mxu1 %v373_v5 }
 0x361   :  { %v463_v7 = vpop.f32.mrf.mxu1 }
 0x362   :  { %v464_v8 = vadd.f32 %v489_v6, %v463_v7 }
 0x363   :  { %v661_v0 = vpop.f32.mrf.mxu1 }
 0x364   :  { %467 = vst [vmem:[#allocation11] sm:$0xff] %v464_v8 }
 0x365   :  { %785 = shalt.err (!%p782_p1)
}
 0x366   :  { %477 = dma.vmem_to_hbm [thread:$0]  %s475_s17, 128, %s973_s9, [#allocation4]  }
 0x367   :  { %800 = dma.done.wait [#allocation4], 128  }
 0x368   :  { %801 = vsyncadd [#allocation4], 4294967168 }
 0x369   :  { %481 = vsyncpa [#allocation3], 1 }
 0x36a   :  { %482 = vsyncpa [#allocation6], 1 }
 0x36b   :  { %483 = vsyncpa [#allocation9], 1 }
 0x36c   :  { %484 = vsyncpa [#allocation4], 1 }

</bundles_post_ra>
